<compile_context>
chip_gen: v6e
topology: v6e:2x2x1
jax: 0.10.0
libtpu: 0.0.40
codegen_flags: <defaults>
</compile_context>

<pallas_src>
import jax
import jax.numpy as jnp
from jax import lax
from jax.experimental import pallas as pl
from jax.experimental.pallas import tpu as pltpu


def _round_up(x, m):
    return ((x + m - 1) // m) * m


def _linear_kernel_single_k(x_ref, w_ref, b_ref, o_ref):
    # Single K step: no accumulator needed; fuse bias add into the store.
    # x_ref: (tm, tk), w_ref: (tn, tk) untransposed, b_ref: (1, tn), o_ref: (tm, tn)
    o_ref[...] = (
        lax.dot_general(
            x_ref[...],
            w_ref[...],
            dimension_numbers=(((1,), (1,)), ((), ())),
            preferred_element_type=jnp.float32,
        )
        + b_ref[...]
    ).astype(o_ref.dtype)


def _linear_kernel_acc(x_ref, w_ref, b_ref, o_ref, acc_ref):
    # Multi-step K: f32 VMEM accumulator persists across the K grid axis.
    k = pl.program_id(2)

    @pl.when(k == 0)
    def _():
        acc_ref[...] = jnp.zeros_like(acc_ref)

    # x @ w.T : contract last dim of x against last dim of w on the MXU.
    acc_ref[...] += lax.dot_general(
        x_ref[...],
        w_ref[...],
        dimension_numbers=(((1,), (1,)), ((), ())),
        preferred_element_type=jnp.float32,
    )

    @pl.when(k == pl.num_programs(2) - 1)
    def _():
        o_ref[...] = (acc_ref[...] + b_ref[...]).astype(o_ref.dtype)


def linear_forward(x, w, b, *, tm=256, tn=256, tk=512):
    """F.linear(x, w, b) = x @ w.T + b.

    x: (..., in_c), w: (out_c, in_c), b: (out_c,) -> (..., out_c).
    Computes in float32.
    """
    lead_shape = x.shape[:-1]
    in_c = x.shape[-1]
    out_c = w.shape[0]

    x2 = x.reshape(-1, in_c).astype(jnp.float32)
    w = w.astype(jnp.float32)
    b = b.astype(jnp.float32)
    B = x2.shape[0]

    # Effective tile sizes: clip to the (padded) problem size while keeping
    # sublane (8) / lane (128) alignment on the last two block dims.
    tm_eff = min(tm, _round_up(B, 8))
    tn_eff = min(tn, _round_up(out_c, 128))
    tk_eff = min(tk, _round_up(in_c, 128))

    Bp = _round_up(B, tm_eff)
    Np = _round_up(out_c, tn_eff)
    Kp = _round_up(in_c, tk_eff)

    # Zero-pad to tile multiples only when necessary.
    if (Bp, Kp) != (B, in_c):
        xp = jnp.zeros((Bp, Kp), jnp.float32).at[:B, :in_c].set(x2)
    else:
        xp = x2
    if (Np, Kp) != (out_c, in_c):
        wp = jnp.zeros((Np, Kp), jnp.float32).at[:out_c, :in_c].set(w)
    else:
        wp = w
    if Np != out_c:
        bp = jnp.zeros((1, Np), jnp.float32).at[0, :out_c].set(b)
    else:
        bp = b.reshape(1, out_c)

    nk = Kp // tk_eff
    grid = (Bp // tm_eff, Np // tn_eff, nk)

    cost = pl.CostEstimate(
        flops=2 * B * in_c * out_c,
        transcendentals=0,
        bytes_accessed=4 * (B * in_c + in_c * out_c + B * out_c),
    )

    in_specs = [
        # input tile (tm, tk)
        pl.BlockSpec((tm_eff, tk_eff), lambda i, j, k: (i, k)),
        # weight tile (tn, tk), untransposed; independent of i so it stays
        # resident in VMEM across the M axis.
        pl.BlockSpec((tn_eff, tk_eff), lambda i, j, k: (j, k)),
        # bias tile (1, tn), resident across M and K.
        pl.BlockSpec((1, tn_eff), lambda i, j, k: (0, j)),
    ]
    out_spec = pl.BlockSpec((tm_eff, tn_eff), lambda i, j, k: (i, j))

    if nk == 1:
        kernel = _linear_kernel_single_k
        scratch_shapes = []
    else:
        kernel = _linear_kernel_acc
        scratch_shapes = [pltpu.VMEM((tm_eff, tn_eff), jnp.float32)]

    out = pl.pallas_call(
        kernel,
        out_shape=jax.ShapeDtypeStruct((Bp, Np), jnp.float32),
        grid_spec=pltpu.PrefetchScalarGridSpec(
            num_scalar_prefetch=0,
            grid=grid,
            in_specs=in_specs,
            out_specs=out_spec,
            scratch_shapes=scratch_shapes,
        ),
        compiler_params=pltpu.CompilerParams(
            dimension_semantics=("parallel", "parallel", "arbitrary"),
        ),
        cost_estimate=cost,
    )(xp, wp, bp)

    return out[:B, :out_c].reshape(*lead_shape, out_c)


if __name__ == "__main__":
    key = jax.random.PRNGKey(0)
    k_x, k_w, k_b, k_x2, k_w2, k_b2 = jax.random.split(key, 6)

    # Case 1: module-native toy shape (B=8, in_c=32, out_c=32).
    # Deterministic parameter init matching the module's __init__:
    #   w = randn(out_c, in_c) * sqrt(2 / in_c),  b = randn(out_c)
    B, in_c, out_c = 8, 32, 32
    w = jax.random.normal(k_w, (out_c, in_c), dtype=jnp.float32) * jnp.sqrt(
        jnp.float32(2.0 / in_c)
    )
    b = jax.random.normal(k_b, (out_c,), dtype=jnp.float32)
    x = jax.random.normal(k_x, (B, in_c), dtype=jnp.float32)

    out = jax.block_until_ready(linear_forward(x, w, b))
    ref = jnp.dot(x, w.T, precision=lax.Precision.HIGHEST) + b
    assert out.shape == (B, out_c)
    assert jnp.allclose(out, ref, atol=1e-5, rtol=1e-5)

    # Case 2: small shapes that still exercise the multi-step (M, N, K) grid
    # and the VMEM accumulator path (grid = (3, 2, 3) with these tiles).
    B2, in_c2, out_c2 = 48, 384, 256
    w2 = jax.random.normal(k_w2, (out_c2, in_c2), dtype=jnp.float32) * jnp.sqrt(
        jnp.float32(2.0 / in_c2)
    )
    b2 = jax.random.normal(k_b2, (out_c2,), dtype=jnp.float32)
    x2 = jax.random.normal(k_x2, (B2, in_c2), dtype=jnp.float32)

    out2 = jax.block_until_ready(linear_forward(x2, w2, b2, tm=16, tn=128, tk=128))
    ref2 = jnp.dot(x2, w2.T, precision=lax.Precision.HIGHEST) + b2
    assert out2.shape == (B2, out_c2)
    assert jnp.allclose(out2, ref2, atol=1e-4, rtol=1e-4)

    print("KERNEL_OK")
</pallas_src>

<mosaic_0001>
module attributes {stable_mosaic.version = 11 : i64} {
  func.func @_linear_kernel_single_k(%arg0: i32, %arg1: i32, %arg2: i32, %arg3: memref<8x128xf32, #tpu.memory_space<vmem>>, %arg4: memref<128x128xf32, #tpu.memory_space<vmem>>, %arg5: memref<1x128xf32, #tpu.memory_space<vmem>>, %arg6: memref<8x128xf32, #tpu.memory_space<vmem>>) attributes {dimension_semantics = [#tpu.dimension_semantics<parallel>, #tpu.dimension_semantics<parallel>, #tpu.dimension_semantics<arbitrary>], iteration_bounds = array<i64: 1, 1, 1>, scalar_prefetch = 0 : i64, scratch_operands = 0 : i64, tpu.core_type = #tpu.core_type<tc>, window_params = [{transform_indices = @transform_0, window_bounds = array<i64: 8, 128>}, {transform_indices = @transform_1, window_bounds = array<i64: 128, 128>}, {transform_indices = @transform_2, window_bounds = array<i64: 1, 128>}, {transform_indices = @transform_3, window_bounds = array<i64: 8, 128>}]} {
    %c0 = arith.constant 0 : index
    %c0_0 = arith.constant 0 : index
    %0 = vector.load %arg3[%c0, %c0_0] : memref<8x128xf32, #tpu.memory_space<vmem>>, vector<8x128xf32>
    %c0_1 = arith.constant 0 : index
    %c0_2 = arith.constant 0 : index
    %1 = vector.load %arg4[%c0_1, %c0_2] : memref<128x128xf32, #tpu.memory_space<vmem>>, vector<128x128xf32>
    %cst = arith.constant dense<0.000000e+00> : vector<8x128xf32>
    %2 = tpu.matmul %0, %1, %cst {dimension_numbers = #tpu.dot_dimension_numbers<[1], [1], [0], [0], [0, 0, 1, 0], [], []>} : vector<8x128xf32>, vector<128x128xf32>, vector<8x128xf32> -> vector<8x128xf32>
    %c0_3 = arith.constant 0 : index
    %c0_4 = arith.constant 0 : index
    %3 = vector.load %arg5[%c0_3, %c0_4] : memref<1x128xf32, #tpu.memory_space<vmem>>, vector<1x128xf32>
    %4 = vector.broadcast %3 : vector<1x128xf32> to vector<8x128xf32>
    %5 = arith.addf %2, %4 : vector<8x128xf32>
    %c0_5 = arith.constant 0 : index
    %c0_6 = arith.constant 0 : index
    %6 = vector.load %arg6[%c0_5, %c0_6] : memref<8x128xf32, #tpu.memory_space<vmem>>, vector<8x128xf32>
    tpu.vector_store %arg6[%c0_5, %c0_6], %5 {strides = array<i32>} : memref<8x128xf32, #tpu.memory_space<vmem>>, vector<8x128xf32>,
    return
  }
  func.func @transform_0(%arg0: i32, %arg1: i32, %arg2: i32) -> (i32, i32) {
    %c0_i32 = arith.constant 0 : i32
    return %arg0, %arg2 : i32, i32
  }
  func.func @transform_1(%arg0: i32, %arg1: i32, %arg2: i32) -> (i32, i32) {
    %c0_i32 = arith.constant 0 : i32
    return %arg1, %arg2 : i32, i32
  }
  func.func @transform_2(%arg0: i32, %arg1: i32, %arg2: i32) -> (i32, i32) {
    %c0_i32 = arith.constant 0 : i32
    %c0_i32_0 = arith.constant 0 : i32
    return %c0_i32, %arg1 : i32, i32
  }
  func.func @transform_3(%arg0: i32, %arg1: i32, %arg2: i32) -> (i32, i32) {
    %c0_i32 = arith.constant 0 : i32
    return %arg0, %arg1 : i32, i32
  }
}

</mosaic_0001>

<bundles_post_ra>
// kernel: tpu_custom_call.1
= control target key start
LH: loop header
LB: loop body
LE: loop exit
PB: predicated region body
PF: predicated region fallthrough
CT: control target
= control target key end

     0   :  { %8 = vsyncpa [#allocation3], 0  ;;  %s317_s0 = inlined_call_operand.hbm [shape: f32[8,128], index: 0, kind: input, shape index: {}]   ;;  %s318_s1 = inlined_call_operand.hbm [shape: f32[128,128], index: 1, kind: input, shape index: {}]   ;;  %s319_s2 = inlined_call_operand.vmem [shape: f32[1,128], index: 2, kind: input, shape index: {}]   ;;  %s320_s3 = inlined_call_operand.hbm [shape: f32[8,128], index: 3, kind: output, shape index: {}]  }
   0x1   :  { %9 = vsyncpa [#allocation6], 0 }
   0x2   :  { %10 = vsyncpa [#allocation4], 0  ;;  %s278_s12 = smov [#allocation2]   ;;  %s279_s14 = smov [#allocation5]  }
   0x3   :  { %s17_s13 = sshll.u32 %s278_s12, 4  ;;  %s26_s15 = sshll.u32 %s279_s14, 4  ;;  %s18_s13 = int_to_ptr.vmem [resolvable:$true] %s17_s13  ;;  %s27_s15 = int_to_ptr.vmem [resolvable:$true] %s26_s15 }
   0x4   :  { %s220_s16 = scalar_lea.vmem %s18_s13, 128  ;;  %p225_p1 = scmp.lt.s32.totalorder %s18_s13, %s18_s13 }
   0x5   :  { %p221_p0 = scmp.ne.s32.totalorder %s18_s13, %s220_s16  ;;  %p226_p2 = scmp.lt.s32.totalorder %s220_s16, %s220_s16 }
   0x7   :  { %p227_p3 = por %p226_p2, %p225_p1 }
   0x9   :  { %p228_p4 = pnand %p227_p3, %p221_p0 }
   0xb   :  { %231 = shalt.err (!%p228_p4)
}
   0xc   :  { %20 = dma.hbm_to_vmem [thread:$0]  %s317_s0, 128, %s18_s13, [#allocation3]  }
   0xd   :  { %s240_s19 = scalar_lea.vmem %s27_s15, 2048  ;;  %p245_p6 = scmp.lt.s32.totalorder %s27_s15, %s27_s15 }
   0xe   :  { %p241_p5 = scmp.ne.s32.totalorder %s27_s15, %s240_s19  ;;  %p246_p7 = scmp.lt.s32.totalorder %s240_s19, %s240_s19 }
  0x10   :  { %p247_p8 = por %p246_p7, %p245_p6 }
  0x12   :  { %p248_p9 = pnand %p247_p8, %p241_p5 }
  0x14   :  { %251 = shalt.err (!%p248_p9)
}
  0x15   :  { %s280_s20 = smov 128   ;;  %s281_s21 = smov 8  }
  0x16   :  { %32 = dma.hbm_to_vmem [thread:$0]  %s318_s1, 2048, %s27_s15, [#allocation6], %s280_s20, %s280_s20, %s281_s21  }
  0x17   :  { %272 = dma.done.wait [#allocation3], 128  }
  0x18   :  { %273 = vsyncadd [#allocation3], 4294967168 }
  0x19   :  { %274 = dma.done.wait [#allocation6], 2048  }
  0x1a   :  { %275 = vsyncadd [#allocation6], 4294965248  ;;  %v282_v0 = vmov 0.0   ;;  %vm283_vm0 = vmmov 0   ;;  %v57_v1 = vld [vmem:[#allocation5 + $0x78] sm:$0xff]  ;;  %v56_v2 = vld [vmem:[#allocation5 + $0x70] sm:$0xff] }
  0x1b   :  { %170 = vmatprep.subr.mxu0 %v282_v0  ;;  %202 = vmatprep.mubr.msk.f32.mxu0 %vm283_vm0, %v282_v0  ;;  %v55_v3 = vld [vmem:[#allocation5 + $0x68] sm:$0xff]  ;;  %v54_v4 = vld [vmem:[#allocation5 + $0x60] sm:$0xff]  ;;  %v53_v5 = vld [vmem:[#allocation5 + $0x58] sm:$0xff]  ;;  %s284_s24 = smov [#allocation7]  }
  0x1c   :  { %171 = vmatpush3.xpose.msra.mxu0 %v57_v1  ;;  %v52_v6 = vld [vmem:[#allocation5 + $0x50] sm:$0xff]  ;;  %v51_v7 = vld [vmem:[#allocation5 + $0x48] sm:$0xff]  ;;  %v50_v8 = vld [vmem:[#allocation5 + $0x40] sm:$0xff]  ;;  %s142_s25 = sshll.u32 %s284_s24, 4  ;;  %s143_s25 = int_to_ptr.vmem [resolvable:$true] %s142_s25 }
  0x1d   :  { %172 = vmatprep.subr.mxu0 %v282_v0  ;;  %v49_v9 = vld [vmem:[#allocation5 + $0x38] sm:$0xff]  ;;  %v48_v10 = vld [vmem:[#allocation5 + $0x30] sm:$0xff]  ;;  %v47_v11 = vld [vmem:[#allocation5 + $0x28] sm:$0xff]  ;;  %s252_s26 = scalar_lea.vmem %s143_s25, 128  ;;  %p257_p11 = scmp.lt.s32.totalorder %s143_s25, %s143_s25 }
  0x1e   :  { %v46_v12 = vld [vmem:[#allocation5 + $0x20] sm:$0xff]  ;;  %v45_v13 = vld [vmem:[#allocation5 + $0x18] sm:$0xff]  ;;  %v44_v14 = vld [vmem:[#allocation5 + $0x10] sm:$0xff]  ;;  %p253_p10 = scmp.ne.s32.totalorder %s143_s25, %s252_s26  ;;  %p258_p12 = scmp.lt.s32.totalorder %s252_s26, %s252_s26 }
  0x1f   :  { %v43_v15 = vld [vmem:[#allocation5 + $0x8] sm:$0xff]  ;;  %v42_v16 = vld [vmem:[#allocation5] sm:$0xff]  ;;  %v41_v17 = vld [vmem:[#allocation2] sm:$0xff] }
  0x20   :  { %173 = vmatpush3.xpose.msra.mxu0 %v56_v2  ;;  %v152_v18 = vld [vmem:[%s319_s2] ss:$0 sm:$0xff]  ;;  %p259_p13 = por %p258_p12, %p257_p11 }
  0x21   :  { %174 = vmatprep.subr.mxu0 %v282_v0 }
  0x22   :  { %p260_p0 = pnand %p259_p13, %p253_p10 }
  0x24   :  { %175 = vmatpush3.xpose.msra.mxu0 %v55_v3 }
  0x25   :  { %176 = vmatprep.subr.mxu0 %v282_v0 }
  0x28   :  { %177 = vmatpush3.xpose.msra.mxu0 %v54_v4 }
  0x29   :  { %178 = vmatprep.subr.mxu0 %v282_v0 }
  0x2c   :  { %179 = vmatpush3.xpose.msra.mxu0 %v53_v5 }
  0x2d   :  { %180 = vmatprep.subr.mxu0 %v282_v0 }
  0x30   :  { %181 = vmatpush3.xpose.msra.mxu0 %v52_v6 }
  0x31   :  { %182 = vmatprep.subr.mxu0 %v282_v0 }
  0x34   :  { %183 = vmatpush3.xpose.msra.mxu0 %v51_v7 }
  0x35   :  { %184 = vmatprep.subr.mxu0 %v282_v0 }
  0x38   :  { %185 = vmatpush3.xpose.msra.mxu0 %v50_v8 }
  0x39   :  { %186 = vmatprep.subr.mxu0 %v282_v0 }
  0x3c   :  { %187 = vmatpush3.xpose.msra.mxu0 %v49_v9 }
  0x3d   :  { %188 = vmatprep.subr.mxu0 %v282_v0 }
  0x40   :  { %189 = vmatpush3.xpose.msra.mxu0 %v48_v10 }
  0x41   :  { %190 = vmatprep.subr.mxu0 %v282_v0 }
  0x44   :  { %191 = vmatpush3.xpose.msra.mxu0 %v47_v11 }
  0x45   :  { %192 = vmatprep.subr.mxu0 %v282_v0 }
  0x48   :  { %193 = vmatpush3.xpose.msra.mxu0 %v46_v12 }
  0x49   :  { %194 = vmatprep.subr.mxu0 %v282_v0 }
  0x4c   :  { %195 = vmatpush3.xpose.msra.mxu0 %v45_v13 }
  0x4d   :  { %196 = vmatprep.subr.mxu0 %v282_v0 }
  0x50   :  { %197 = vmatpush3.xpose.msra.mxu0 %v44_v14 }
  0x51   :  { %198 = vmatprep.subr.mxu0 %v282_v0 }
  0x54   :  { %199 = vmatpush3.xpose.msra.mxu0 %v43_v15 }
  0x55   :  { %200 = vmatprep.subr.mxu0 %v282_v0 }
  0x58   :  { %201 = vmatpush3.xpose.msra.mxu0 %v42_v16 }
  0x5b   :  { %203 = vmatmul.mubr.f32.vlgmr.msra.gmra.mxu0 %v41_v17 }
 0x11b   :  { %v131_v19 = vpop.f32.mrf.mxu0 }
 0x11c   :  { %v132_v20 = vadd.f32 %v152_v18, %v131_v19 }
 0x11d   :  { %v204_v21 = vpop.f32.mrf.mxu0 }
 0x11e   :  { %135 = vst [vmem:[#allocation7] sm:$0xff] %v132_v20 }
 0x11f   :  { %263 = shalt.err (!%p260_p0)
}
 0x120   :  { %145 = dma.vmem_to_hbm [thread:$0]  %s143_s25, 128, %s320_s3, [#allocation4]  }
 0x121   :  { %276 = dma.done.wait [#allocation4], 128  }
 0x122   :  { %277 = vsyncadd [#allocation4], 4294967168 }
 0x123   :  { %149 = vsyncpa [#allocation3], 1 }
 0x124   :  { %150 = vsyncpa [#allocation6], 1 }
 0x125   :  { %151 = vsyncpa [#allocation4], 1 }

</bundles_post_ra>
